<compile_context>
chip_gen: v7x
topology: tpu7x:2x2x1
jax: 0.10.0
libtpu: 0.0.40
codegen_flags: <defaults>
</compile_context>

<pallas_src>
import jax
import jax.numpy as jnp
from jax.experimental import pallas as pl
from jax.experimental.pallas import tpu as pltpu


def attention_kernel(hidp_ref, enc_ref, we_ref, v_ref, ctx_ref, w_ref):
    # Per-grid-step views (one batch tile of TB rows):
    #   hidp_ref : (TB, H) f32   hidden @ Wh + bias (precomputed in the wrapper)
    #   enc_ref  : (TB, L, H) f32 encoder outputs
    #   we_ref   : (H, H) bf16   encoder half of attn.weight (transposed)
    #   v_ref    : (1, H) f32    v.weight row
    #   ctx_ref  : (TB, H) f32   context output
    #   w_ref    : (TB, L) f32   attention-weight output (L on lanes)
    TB, L, H = enc_ref.shape

    enc = enc_ref[...]                                            # (TB, L, H) f32

    # energy = tanh(hidden@Wh + b + enc@We); bf16 MXU operands, f32 accumulate.
    # The (TB, L, H) -> (TB*L, H) merge is a free view when L % 8 == 0 (it
    # falls back to an in-VMEM copy otherwise, which is correct but slower).
    enc_proj = jnp.dot(
        enc.reshape(TB * L, H).astype(jnp.bfloat16), we_ref[...],
        preferred_element_type=jnp.float32).reshape(TB, L, H)      # (TB, L, H)
    energy = jnp.tanh(enc_proj + hidp_ref[...][:, None, :])        # (TB, L, H)

    # scores: VPU multiply + cross-lane reduce (avoids an N=1 MXU matmul).
    scores = jnp.sum(energy * v_ref[...], axis=-1)                 # (TB, L)

    # softmax over L, kept on the lane axis. Exact reciprocal (not the approx
    # EUP one) so the returned weights sum to 1 to f32 precision.
    m = jnp.max(scores, axis=-1, keepdims=True)                    # (TB, 1)
    e = jnp.exp(scores - m)                                        # (TB, L)
    s = jnp.sum(e, axis=-1, keepdims=True)                         # (TB, 1)
    w = e * (1.0 / s)                                              # (TB, L)

    # context = sum_L (enc * w)  -> (TB, H)
    ctx = jnp.sum(enc * w[:, :, None], axis=1)

    ctx_ref[...] = ctx.astype(ctx_ref.dtype)
    w_ref[...] = w.astype(w_ref.dtype)


def _choose_batch_tile(B, L, H, itemsize=4, target_block_bytes=4 << 20):
    """Pick the batch tile TB so the encoder block (TB*L*H*itemsize bytes) is
    ~4 MiB: large full-size DMAs on every generation while the per-step VMEM
    footprint stays safe on v7x's 64 MiB. Keep TB a multiple of 8 (sublanes)
    when TB < B, and keep >= 2 grid steps when the batch is big enough so
    v7x's two TensorCores both get work on the "parallel" axis."""
    bytes_per_row = max(1, L * H * itemsize)
    tb = max(1, target_block_bytes // bytes_per_row)
    if B >= 16:
        tb = min(tb, (B + 1) // 2)      # at least 2 grid steps for 2 TCs
    if tb >= B:
        return B
    if tb >= 8:
        return (tb // 8) * 8
    # Huge L*H: a single batch row already exceeds the VMEM target.
    # TODO(synk): sub-8-row tiles are sublane-masked; fine for correctness.
    return tb


def attention_pallas(hidden, encoder_outputs, wh, we, bias, v_row):
    """hidden: (B, H), encoder_outputs: (B, L, H).
    wh, we: (H, H); bias: (1, H); v_row: (1, H).
    Returns (context (B, H), attention_weights (B, L))."""
    B, L, H = encoder_outputs.shape
    itemsize = jnp.dtype(encoder_outputs.dtype).itemsize

    # Hoisted per-row hidden projection: one full-size XLA matmul over the
    # whole batch; the kernel only streams the tiny (B, H) result.
    hid_proj = (hidden @ wh + bias).astype(jnp.float32)            # (B, H)
    # Resident MXU operand in bf16: halves its DMA/VMEM (it is double-buffered).
    we_bf16 = we.astype(jnp.bfloat16)                              # (H, H)

    tb = _choose_batch_tile(B, L, H, itemsize)
    grid = (pl.cdiv(B, tb),)             # ragged last block allowed (no jnp.pad)

    enc_block_bytes = tb * L * H * itemsize
    # ~2x double-buffered enc block + the f32 (TB,L,H) temporaries the compiler
    # materializes (enc_proj / energy / weighted enc) + bf16 copy + small blocks.
    vmem_limit = int(min(48 << 20, max(16 << 20, 8 * enc_block_bytes)))

    ctx, w = pl.pallas_call(
        attention_kernel,
        out_shape=(
            jax.ShapeDtypeStruct((B, H), jnp.float32),
            jax.ShapeDtypeStruct((B, L), jnp.float32),
        ),
        grid_spec=pltpu.PrefetchScalarGridSpec(
            num_scalar_prefetch=0,
            grid=grid,
            in_specs=[
                pl.BlockSpec((tb, H), lambda b: (b, 0)),        # hid_proj
                pl.BlockSpec((tb, L, H), lambda b: (b, 0, 0)),  # encoder_outputs
                pl.BlockSpec((H, H), lambda b: (0, 0)),         # We (bf16)
                pl.BlockSpec((1, H), lambda b: (0, 0)),         # v row
            ],
            out_specs=[
                pl.BlockSpec((tb, H), lambda b: (b, 0)),        # context
                pl.BlockSpec((tb, L), lambda b: (b, 0)),        # weights (lane-dense)
            ],
        ),
        compiler_params=pltpu.CompilerParams(
            dimension_semantics=("parallel",),
            vmem_limit_bytes=vmem_limit),
    )(hid_proj, encoder_outputs, we_bf16, v_row)

    return ctx, w


def attention_ref(hidden, encoder_outputs, wh, we, bias, v_row):
    """Pure-JAX f32 reference matching the PyTorch forward."""
    energy = jnp.tanh(hidden[:, None, :] @ wh + encoder_outputs @ we + bias)  # (B, L, H)
    scores = jnp.einsum('blh,h->bl', energy, v_row[0])                        # (B, L)
    weights = jax.nn.softmax(scores, axis=1)
    context = jnp.sum(encoder_outputs * weights[:, :, None], axis=1)          # (B, H)
    return context, weights


if __name__ == "__main__":
    B, L, H = 2, 8, 32

    key = jax.random.PRNGKey(0)
    k_hid, k_enc, k_attn, k_b, k_v = jax.random.split(key, 5)

    hidden = jax.random.normal(k_hid, (B, H), dtype=jnp.float32)
    encoder_outputs = jax.random.normal(k_enc, (B, L, H), dtype=jnp.float32)

    # Deterministic parameter init (shapes follow nn.Linear(2H, H) and nn.Linear(H, 1)).
    bound_attn = 1.0 / jnp.sqrt(2.0 * H)
    w_attn = jax.random.uniform(k_attn, (2 * H, H), dtype=jnp.float32,
                                minval=-bound_attn, maxval=bound_attn)
    wh = w_attn[:H, :]            # (H, H) acts on repeated_hidden
    we = w_attn[H:, :]            # (H, H) acts on encoder_outputs
    bias = jax.random.uniform(k_b, (1, H), dtype=jnp.float32,
                              minval=-bound_attn, maxval=bound_attn)
    bound_v = 1.0 / jnp.sqrt(float(H))
    v_row = jax.random.uniform(k_v, (1, H), dtype=jnp.float32,
                               minval=-bound_v, maxval=bound_v)

    ctx, attn_w = attention_pallas(hidden, encoder_outputs, wh, we, bias, v_row)
    ctx = jax.block_until_ready(ctx)
    attn_w = jax.block_until_ready(attn_w)

    ctx_ref, attn_w_ref = attention_ref(hidden, encoder_outputs, wh, we, bias, v_row)
    # Tolerance accounts for the bf16 MXU operands (f32 accumulation); the
    # softmax itself is exact (weights sum to 1 to f32 precision).
    assert jnp.allclose(ctx, ctx_ref, atol=1e-2, rtol=1e-2)
    assert jnp.allclose(attn_w, attn_w_ref, atol=1e-2, rtol=1e-2)
    assert jnp.allclose(jnp.sum(attn_w, axis=1), jnp.ones((B,)), atol=1e-5)

    print("KERNEL_OK")
</pallas_src>

<mosaic_0001>
module attributes {stable_mosaic.version = 11 : i64} {
  func.func @attention_kernel(%arg0: i32, %arg1: memref<2x32xf32, #tpu.memory_space<vmem>>, %arg2: memref<2x8x32xf32, #tpu.memory_space<vmem>>, %arg3: memref<32x32xbf16, #tpu.memory_space<vmem>>, %arg4: memref<1x32xf32, #tpu.memory_space<vmem>>, %arg5: memref<2x32xf32, #tpu.memory_space<vmem>>, %arg6: memref<2x8xf32, #tpu.memory_space<vmem>>) attributes {dimension_semantics = [#tpu.dimension_semantics<parallel>], iteration_bounds = array<i64: 1>, scalar_prefetch = 0 : i64, scratch_operands = 0 : i64, tpu.core_type = #tpu.core_type<tc>, window_params = [{transform_indices = @transform_0, window_bounds = array<i64: 2, 32>}, {transform_indices = @transform_1, window_bounds = array<i64: 2, 8, 32>}, {pipeline_mode = #tpu.pipeline_mode<synchronous>, transform_indices = @transform_2, window_bounds = array<i64: 32, 32>}, {pipeline_mode = #tpu.pipeline_mode<synchronous>, transform_indices = @transform_3, window_bounds = array<i64: 1, 32>}, {transform_indices = @transform_4, window_bounds = array<i64: 2, 32>}, {transform_indices = @transform_5, window_bounds = array<i64: 2, 8>}]} {
    %c0 = arith.constant 0 : index
    %c0_0 = arith.constant 0 : index
    %c0_1 = arith.constant 0 : index
    %0 = vector.load %arg2[%c0, %c0_0, %c0_1] : memref<2x8x32xf32, #tpu.memory_space<vmem>>, vector<2x8x32xf32>
    %1 = vector.shape_cast %0 : vector<2x8x32xf32> to vector<16x32xf32>
    %2 = arith.truncf %1 : vector<16x32xf32> to vector<16x32xbf16>
    %c0_2 = arith.constant 0 : index
    %c0_3 = arith.constant 0 : index
    %3 = vector.load %arg3[%c0_2, %c0_3] : memref<32x32xbf16, #tpu.memory_space<vmem>>, vector<32x32xbf16>
    %cst = arith.constant dense<0.000000e+00> : vector<16x32xf32>
    %4 = tpu.matmul %2, %3, %cst {dimension_numbers = #tpu.dot_dimension_numbers<[1], [0], [0], [1], [0, 0, 1, 1], [], []>} : vector<16x32xbf16>, vector<32x32xbf16>, vector<16x32xf32> -> vector<16x32xf32>
    %5 = vector.shape_cast %4 : vector<16x32xf32> to vector<2x8x32xf32>
    %c0_4 = arith.constant 0 : index
    %c0_5 = arith.constant 0 : index
    %6 = vector.load %arg1[%c0_4, %c0_5] : memref<2x32xf32, #tpu.memory_space<vmem>>, vector<2x32xf32>
    %7 = vector.shape_cast %6 : vector<2x32xf32> to vector<2x1x32xf32>
    %8 = vector.broadcast %7 : vector<2x1x32xf32> to vector<2x8x32xf32>
    %9 = arith.addf %5, %8 : vector<2x8x32xf32>
    %10 = math.tanh %9 : vector<2x8x32xf32>
    %c0_6 = arith.constant 0 : index
    %c0_7 = arith.constant 0 : index
    %11 = vector.load %arg4[%c0_6, %c0_7] : memref<1x32xf32, #tpu.memory_space<vmem>>, vector<1x32xf32>
    %12 = vector.shape_cast %11 : vector<1x32xf32> to vector<1x1x32xf32>
    %13 = vector.broadcast %12 : vector<1x1x32xf32> to vector<2x8x32xf32>
    %14 = arith.mulf %10, %13 : vector<2x8x32xf32>
    %cst_8 = arith.constant dense<0.000000e+00> : vector<2x8xf32>
    %15 = vector.multi_reduction <add>, %14, %cst_8 [2] : vector<2x8x32xf32> to vector<2x8xf32>
    %cst_9 = arith.constant dense<0xFF800000> : vector<2xf32>
    %16 = vector.multi_reduction <maximumf>, %15, %cst_9 [1] : vector<2x8xf32> to vector<2xf32>
    %17 = vector.shape_cast %16 : vector<2xf32> to vector<2x1xf32>
    %18 = vector.broadcast %17 : vector<2x1xf32> to vector<2x8xf32>
    %19 = arith.subf %15, %18 : vector<2x8xf32>
    %20 = math.exp %19 : vector<2x8xf32>
    %cst_10 = arith.constant dense<0.000000e+00> : vector<2xf32>
    %21 = vector.multi_reduction <add>, %20, %cst_10 [1] : vector<2x8xf32> to vector<2xf32>
    %22 = vector.shape_cast %21 : vector<2xf32> to vector<2x1xf32>
    %cst_11 = arith.constant 1.000000e+00 : f32
    %23 = vector.broadcast %cst_11 : f32 to vector<2x1xf32>
    %24 = arith.divf %23, %22 : vector<2x1xf32>
    %25 = vector.broadcast %24 : vector<2x1xf32> to vector<2x8xf32>
    %26 = arith.mulf %20, %25 : vector<2x8xf32>
    %27 = vector.shape_cast %26 : vector<2x8xf32> to vector<2x8x1xf32>
    %28 = vector.broadcast %27 : vector<2x8x1xf32> to vector<2x8x32xf32>
    %29 = arith.mulf %0, %28 : vector<2x8x32xf32>
    %cst_12 = arith.constant dense<0.000000e+00> : vector<2x32xf32>
    %30 = vector.multi_reduction <add>, %29, %cst_12 [1] : vector<2x8x32xf32> to vector<2x32xf32>
    %c0_13 = arith.constant 0 : index
    %c0_14 = arith.constant 0 : index
    %31 = vector.load %arg5[%c0_13, %c0_14] : memref<2x32xf32, #tpu.memory_space<vmem>>, vector<2x32xf32>
    tpu.vector_store %arg5[%c0_13, %c0_14], %30 {strides = array<i32>} : memref<2x32xf32, #tpu.memory_space<vmem>>, vector<2x32xf32>,
    %c0_15 = arith.constant 0 : index
    %c0_16 = arith.constant 0 : index
    %32 = vector.load %arg6[%c0_15, %c0_16] : memref<2x8xf32, #tpu.memory_space<vmem>>, vector<2x8xf32>
    tpu.vector_store %arg6[%c0_15, %c0_16], %26 {strides = array<i32>} : memref<2x8xf32, #tpu.memory_space<vmem>>, vector<2x8xf32>,
    return
  }
  func.func @transform_0(%arg0: i32) -> (i32, i32) {
    %c0_i32 = arith.constant 0 : i32
    %c0_i32_0 = arith.constant 0 : i32
    return %arg0, %c0_i32 : i32, i32
  }
  func.func @transform_1(%arg0: i32) -> (i32, i32, i32) {
    %c0_i32 = arith.constant 0 : i32
    %c0_i32_0 = arith.constant 0 : i32
    %c0_i32_1 = arith.constant 0 : i32
    return %arg0, %c0_i32, %c0_i32_0 : i32, i32, i32
  }
  func.func @transform_2(%arg0: i32) -> (i32, i32) {
    %c0_i32 = arith.constant 0 : i32
    %c0_i32_0 = arith.constant 0 : i32
    %c0_i32_1 = arith.constant 0 : i32
    return %c0_i32, %c0_i32_0 : i32, i32
  }
  func.func @transform_3(%arg0: i32) -> (i32, i32) {
    %c0_i32 = arith.constant 0 : i32
    %c0_i32_0 = arith.constant 0 : i32
    %c0_i32_1 = arith.constant 0 : i32
    return %c0_i32, %c0_i32_0 : i32, i32
  }
  func.func @transform_4(%arg0: i32) -> (i32, i32) {
    %c0_i32 = arith.constant 0 : i32
    %c0_i32_0 = arith.constant 0 : i32
    return %arg0, %c0_i32 : i32, i32
  }
  func.func @transform_5(%arg0: i32) -> (i32, i32) {
    %c0_i32 = arith.constant 0 : i32
    %c0_i32_0 = arith.constant 0 : i32
    return %arg0, %c0_i32 : i32, i32
  }
}

</mosaic_0001>

<bundles_post_ra>
// kernel: tpu_custom_call.1
= control target key start
LH: loop header
LB: loop body
LE: loop exit
PB: predicated region body
PF: predicated region fallthrough
CT: control target
= control target key end

     0   :  { %11 = vsyncpa [#allocation3], 0  ;;  %s616_s0 = inlined_call_operand.hbm [shape: f32[2,32], index: 0, kind: input, shape index: {}]   ;;  %s617_s1 = inlined_call_operand.hbm [shape: f32[2,8,32], index: 1, kind: input, shape index: {}]   ;;  %s618_s2 = inlined_call_operand.hbm [shape: bf16[32,32], index: 2, kind: input, shape index: {}]   ;;  %s619_s3 = inlined_call_operand.vmem [shape: f32[1,32], index: 3, kind: input, shape index: {}]   ;;  %s620_s4 = inlined_call_operand.hbm [shape: f32[2,32], index: 4, kind: output, shape index: {0}]   ;;  %s621_s5 = inlined_call_operand.hbm [shape: f32[2,8], index: 5, kind: output, shape index: {1}]  }
   0x1   :  { %12 = vsyncpa [#allocation6], 0 }
   0x2   :  { %13 = vsyncpa [#allocation4], 0 }
   0x3   :  { %14 = vsyncpa [#allocation10], 0  ;;  %s484_s18 = smov [#allocation5]   ;;  %s366_s22 = scalar_lea.hbm %s617_s1, 256 }
   0x4   :  { %s30_s19 = sshll.u32 %s484_s18, 4  ;;  %p367_p0 = scmp.ne.s32.totalorder %s617_s1, %s366_s22  ;;  %s31_s19 = int_to_ptr.vmem [resolvable:$true] %s30_s19 }
   0x5   :  { %p370_p1 = scmp.lt.u32.totalorder %s366_s22, %s617_s1 }
   0x7   :  { %p372_p2 = pnand %p370_p1, %p367_p0 }
   0x9   :  { %375 = shalt.err (!%p372_p2)
}
   0xa   :  { %s376_s27 = scalar_lea.vmem %s31_s19, 256  ;;  %p381_p4 = scmp.lt.s32.totalorder %s31_s19, %s31_s19 }
   0xb   :  { %p377_p3 = scmp.ne.s32.totalorder %s31_s19, %s376_s27  ;;  %p382_p5 = scmp.lt.s32.totalorder %s376_s27, %s376_s27 }
   0xd   :  { %p383_p6 = por %p382_p5, %p381_p4 }
   0xf   :  { %p384_p7 = pnand %p383_p6, %p377_p3 }
  0x11   :  { %387 = shalt.err (!%p384_p7)
}
  0x12   :  { %s485_s28 = smov 128   ;;  %s486_s29 = smov 8  }
  0x13   :  { %36 = dma.hbm_to_vmem [thread:$0]  %s617_s1, 256, %s31_s19, [#allocation6], %s485_s28, %s485_s28, %s486_s29  }
  0x14   :  { %s487_s7 = smov [#allocation2]   ;;  %s488_s9 = smov [#allocation7]  }
  0x15   :  { %s21_s8 = sshll.u32 %s487_s7, 4  ;;  %s42_s10 = sshll.u32 %s488_s9, 4  ;;  %s22_s8 = int_to_ptr.vmem [resolvable:$true] %s21_s8  ;;  %s43_s10 = int_to_ptr.vmem [resolvable:$true] %s42_s10 }
  0x16   :  { %s388_s13 = scalar_lea.hbm %s616_s0, 32 }
  0x17   :  { %p389_p8 = scmp.ne.s32.totalorder %s616_s0, %s388_s13  ;;  %p392_p9 = scmp.lt.u32.totalorder %s388_s13, %s616_s0 }
  0x19   :  { %p394_p10 = pnand %p392_p9, %p389_p8 }
  0x1b   :  { %397 = shalt.err (!%p394_p10)
}
  0x1c   :  { %s398_s1 = scalar_lea.vmem %s22_s8, 32  ;;  %p403_p12 = scmp.lt.s32.totalorder %s22_s8, %s22_s8 }
  0x1d   :  { %p399_p11 = scmp.ne.s32.totalorder %s22_s8, %s398_s1  ;;  %p404_p13 = scmp.lt.s32.totalorder %s398_s1, %s398_s1 }
  0x1f   :  { %p405_p0 = por %p404_p13, %p403_p12 }
  0x21   :  { %p406_p1 = pnand %p405_p0, %p399_p11 }
  0x23   :  { %409 = shalt.err (!%p406_p1)
}
  0x24   :  { %24 = dma.hbm_to_vmem [thread:$0]  %s616_s0, 32, %s22_s8, [#allocation3]  }
  0x25   :  { %s410_s22 = scalar_lea.hbm %s618_s2, 256 }
  0x26   :  { %p411_p2 = scmp.ne.s32.totalorder %s618_s2, %s410_s22  ;;  %p414_p3 = scmp.lt.u32.totalorder %s410_s22, %s618_s2 }
  0x28   :  { %p416_p4 = pnand %p414_p3, %p411_p2 }
  0x2a   :  { %419 = shalt.err (!%p416_p4)
}
  0x2b   :  { %s420_s27 = scalar_lea.vmem %s43_s10, 256  ;;  %p425_p6 = scmp.lt.s32.totalorder %s43_s10, %s43_s10 }
  0x2c   :  { %p421_p5 = scmp.ne.s32.totalorder %s43_s10, %s420_s27  ;;  %p426_p7 = scmp.lt.s32.totalorder %s420_s27, %s420_s27 }
  0x2e   :  { %p427_p8 = por %p426_p7, %p425_p6 }
  0x30   :  { %p428_p9 = pnand %p427_p8, %p421_p5 }
  0x32   :  { %431 = shalt.err (!%p428_p9)
}
  0x33   :  { %s489_s0 = smov 64   ;;  %s490_s28 = smov 4  }
  0x34   :  { %48 = dma.hbm_to_vmem [thread:$0]  %s618_s2, 256, %s43_s10, [#allocation6], %s489_s0, %s489_s0, %s490_s28  }
  0x35   :  { %476 = dma.done.wait [#allocation3], 32  }
  0x36   :  { %477 = vsyncadd [#allocation3], 4294967264 }
  0x37   :  { %478 = dma.done.wait [#allocation6], 512  }
  0x38   :  { %479 = vsyncadd [#allocation6], 4294966784  ;;  %v491_v0 = vmov 0.0   ;;  %vm492_vm0 = vmmov 0   ;;  %v354_v1 = vld [vmem:[#allocation7] sm:$0xff]   ;;  %v355_v2 = vld [vmem:[#allocation7 + $0x8] sm:$0xff]   ;;  %v138_v8 = vlaneseq }
  0x39   :  { %331 = vmatprep.subr.bf16.mxu0 %v491_v0  ;;  %335 = vmatprep.mubr.msk.bf16.mxu0 %vm492_vm0, %v491_v0  ;;  %v563_v3 = vld [vmem:[#allocation5] sm:$0xff]  ;;  %v565_v4 = vld [vmem:[#allocation5 + $0x8] sm:$0xff]  ;;  %vm80_vm1 = vcmask 261120   ;;  %v493_v6 = vmov 1966171168   ;;  %vm190_vm2 = vcmask 1041409  }
  0x3a   :  { %332 = vmatpush3.bf16.msra.mxu0 %v354_v1  ;;  %v63_v5 = vpack.c.bf16 %v565_v4, %v563_v3  ;;  %v136_v7 = vunpack.c.l.s4 %v493_v6  ;;  %v570_v10 = vshrl.u32 %v138_v8, 7  ;;  %v326_v11 = vld.sshfl [vmem:[#allocation2] sm:$0x11 pattern:$0x75316420]  ;;  %v181_v32 = vand.u32 127, %v138_v8 }
  0x3b   :  { %333 = vmatprep.subr.bf16.mxu0 %v491_v0  ;;  %v134_v13 = vcombine.high %v326_v11, %v326_v11  ;;  %v327_v25 = vld [vmem:[%s619_s3] ss:$0 sm:$0xff]  ;;  %vm193_vm3 = vcmask 58368   ;;  %v494_v40 = vmov 0   ;;  %s495_s3 = smov [#allocation9]  }
  0x3c   :  { %v137_v9 = vunpack.c.0.s8 %v136_v7  ;;  %v151_v15 = vsub.s32 0, %v570_v10  ;;  %v184_v34 = vsub.s32 %v181_v32, %v570_v10  ;;  %353 = vset.pattern.permute.xlu0 %v494_v40  ;;  %352 = vset.pattern.permute.xlu1 %v494_v40  ;;  %v204_v41 = vsub.s32 1, %v570_v10  ;;  %s309_s7 = sshll.u32 %s495_s3, 4  ;;  %s310_s7 = int_to_ptr.vmem [resolvable:$true] %s309_s7 }
  0x3d   :  { %s432_s8 = scalar_lea.vmem %s310_s7, 32  ;;  %p437_p11 = scmp.lt.s32.totalorder %s310_s7, %s310_s7 }
  0x3e   :  { %334 = vmatpush3.bf16.msra.mxu0 %v355_v2  ;;  %v140_v12 = vsub.s32 %v137_v9, %v570_v10  ;;  %p433_p10 = scmp.ne.s32.totalorder %s310_s7, %s432_s8  ;;  %p438_p12 = scmp.lt.s32.totalorder %s432_s8, %s432_s8 }
  0x40   :  { %v141_v14 = vrot.slane %v326_v11, %v140_v12  ;;  %v148_v16 = vrot.slane %v134_v13, %v140_v12  ;;  %p439_p13 = por %p438_p12, %p437_p11 }
  0x41   :  { %336 = vmatmul.mubr.msk.bf16.vlgmr.msra.gmra.mrb[0].mxu0 %vm80_vm1, %v63_v5 }
  0x42   :  { %v152_v17 = vrot.slane %v141_v14, %v151_v15  ;;  %v156_v18 = vrot.slane %v148_v16, %v151_v15  ;;  %p440_p0 = pnand %p439_p13, %p433_p10 }
 0x114   :  { %v118_v19 = vpop.f32.mrb[0].mxu0 }
 0x115   :  { %v159_v20 = vadd.f32 %v152_v17, %v118_v19  ;;  %v337_v21 = vpop.f32.mrb[1].mxu0 }
 0x116   :  { %v121_v22 = vpop.f32.mrb[2].mxu0 }
 0x117   :  { %356 = vtanh.f32 %v159_v20  ;;  %v160_v23 = vadd.f32 %v156_v18, %v121_v22  ;;  %v338_v24 = vpop.f32.mrb[3].mxu0 }
 0x119   :  { %358 = vtanh.f32 %v160_v23 }
 0x121   :  { %v357_v26 = vpop.eup %356 }
 0x122   :  { %v170_v27 = vmul.f32 %v357_v26, %v327_v25 }
 0x123   :  { %v359_v28 = vpop.eup %358 }
 0x124   :  { %v172_v29 = vsel %vm80_vm1, %v170_v27, 0.0  ;;  %v171_v30 = vmul.f32 %v359_v28, %v327_v25 }
 0x125   :  { %173 = vadd.xlane.f32.xlu0 %v172_v29 }
 0x126   :  { %v175_v31 = vsel %vm80_vm1, %v171_v30, 0.0 }
 0x129   :  { %176 = vadd.xlane.f32.xlu0 %v175_v31 }
 0x1b2   :  { %v174_v33 = vpop.xlane.xlu0 %173 }
 0x1b3   :  { %v185_v36 = vrot.slane %v174_v33, %v184_v34 }
 0x1b6   :  { %v177_v35 = vpop.xlane.xlu0 %176 }
 0x1b7   :  { %v189_v37 = vrot.slane %v177_v35, %v184_v34 }
 0x1b9   :  { %v191_v38 = vsel %vm190_vm2, %v189_v37, %v185_v36 }
 0x1ba   :  { %v194_v39 = vsel %vm193_vm3, %v191_v38, -inf }
 0x1bb   :  { %195 = vmax.xlane.f32.xlu1 %v194_v39 }
 0x248   :  { %v196_v42 = vpop.xlane.xlu1 %195 }
 0x249   :  { %v201_v43 = vrot.slane %v196_v42, %v151_v15  ;;  %v205_v44 = vrot.slane %v196_v42, %v204_v41 }
 0x24b   :  { %v208_v45 = vsub.f32 %v174_v33, %v201_v43  ;;  %v209_v46 = vsub.f32 %v177_v35, %v205_v44 }
 0x24d   :  { %v210_v47 = vmul.f32 1.442695, %v208_v45  ;;  %v212_v48 = vmul.f32 1.442695, %v209_v46 }
 0x24f   :  { %360 = vpow2.f32 %v210_v47 }
 0x250   :  { %362 = vpow2.f32 %v212_v48 }
 0x259   :  { %v361_v49 = vpop.eup %360 }
 0x25a   :  { %v363_v50 = vpop.eup %362  ;;  %217 = vperm.xlu1 %352, %v361_v49  }
 0x25b   :  { %220 = vperm.xlu0 %353, %v363_v50  }
 0x2d9   :  { %v218_v51 = vpop.permute.xlu1 %217 }
 0x2da   :  { %v221_v52 = vpop.permute.xlu0 %220  ;;  %v225_v53 = vrot.slane %v218_v51, %v184_v34 }
 0x2db   :  { %v229_v54 = vrot.slane %v221_v52, %v184_v34 }
 0x2dd   :  { %v230_v55 = vsel %vm190_vm2, %v229_v54, %v225_v53 }
 0x2de   :  { %v232_v56 = vsel %vm193_vm3, %v230_v55, 0.0 }
 0x2df   :  { %233 = vadd.xlane.f32.xlu1 %v232_v56 }
 0x36c   :  { %v234_v57 = vpop.xlane.xlu1 %233 }
 0x36d   :  { %364 = vrcp.f32 %v234_v57 }
 0x377   :  { %v365_v58 = vpop.eup %364 }
 0x378   :  { %v241_v59 = vrot.slane %v365_v58, %v151_v15  ;;  %v245_v61 = vrot.slane %v365_v58, %v204_v41 }
 0x37a   :  { %v248_v60 = vmul.f32 %v361_v49, %v241_v59  ;;  %v249_v62 = vmul.f32 %v363_v50, %v245_v61 }
 0x37c   :  { %252 = vperm.xlu0 %353, %v248_v60  }
 0x380   :  { %257 = vperm.xlu0 %353, %v249_v62  }
 0x3fb   :  { %v253_v63 = vpop.permute.xlu0 %252 }
 0x3fc   :  { %v260_v0 = vmul.f32 %v253_v63, %v563_v3  ;;  %v285_v6 = vrot.slane %v253_v63, %v184_v34 }
 0x3fe   :  { %v262_v1 = vsel %vm80_vm1, %v260_v0, 0.0 }
 0x3ff   :  { %v263_v2 = vrot.slane %v262_v1, 4  ;;  %v258_v5 = vpop.permute.xlu0 %257 }
 0x400   :  { %v261_v7 = vmul.f32 %v258_v5, %v565_v4  ;;  %v289_v8 = vrot.slane %v258_v5, %v184_v34 }
 0x401   :  { %v264_v9 = vadd.f32 %v263_v2, %v262_v1 }
 0x402   :  { %v269_v10 = vsel %vm80_vm1, %v261_v7, 0.0  ;;  %v290_v11 = vsel %vm190_vm2, %v289_v8, %v285_v6 }
 0x403   :  { %v265_v12 = vrot.slane %v264_v9, 2  ;;  %v270_v13 = vrot.slane %v269_v10, 4  ;;  %292 = vst.msk [vmem:[#allocation9] sm:$0x3] %vm193_vm3, %v290_v11 }
 0x404   :  { %443 = shalt.err (!%p440_p0)
}
 0x405   :  { %s444_s11 = scalar_lea.hbm %s621_s5, 32 }
 0x406   :  { %p445_p1 = scmp.ne.s32.totalorder %s621_s5, %s444_s11  ;;  %p448_p2 = scmp.lt.u32.totalorder %s444_s11, %s621_s5 }
 0x408   :  { %p450_p3 = pnand %p448_p2, %p445_p1 }
 0x40a   :  { %453 = shalt.err (!%p450_p3)
}
 0x40b   :  { %312 = dma.vmem_to_hbm [thread:$0]  %s310_s7, 32, %s621_s5, [#allocation10]   ;;  %v266_v3 = vadd.f32 %v265_v12, %v264_v9  ;;  %v271_v4 = vadd.f32 %v270_v13, %v269_v10  ;;  %vm280_vm4 = vcmask 254976  }
 0x40c   :  { %s496_s1 = smov [#allocation8]  }
 0x40d   :  { %v272_v14 = vrot.slane %v271_v4, 2  ;;  %v267_v15 = vrot.slane %v266_v3, 1  ;;  %s299_s18 = sshll.u32 %s496_s1, 4  ;;  %s300_s18 = int_to_ptr.vmem [resolvable:$true] %s299_s18 }
 0x40e   :  { %s454_s19 = scalar_lea.vmem %s300_s18, 32  ;;  %p459_p5 = scmp.lt.s32.totalorder %s300_s18, %s300_s18 }
 0x40f   :  { %v273_v16 = vadd.f32 %v272_v14, %v271_v4  ;;  %v268_v19 = vadd.f32 %v267_v15, %v266_v3  ;;  %p455_p4 = scmp.ne.s32.totalorder %s300_s18, %s454_s19  ;;  %p460_p6 = scmp.lt.s32.totalorder %s454_s19, %s454_s19 }
 0x411   :  { %v274_v17 = vrot.slane %v273_v16, 1  ;;  %p461_p7 = por %p460_p6, %p459_p5 }
 0x413   :  { %v275_v18 = vadd.f32 %v274_v17, %v273_v16  ;;  %p462_p8 = pnand %p461_p7, %p455_p4 }
 0x415   :  { %v278_v20 = vsel %vm190_vm2, %v275_v18, %v268_v19 }
 0x416   :  { %281 = vst.msk [vmem:[#allocation8] sm:$0x3] %vm280_vm4, %v278_v20 }
 0x417   :  { %465 = shalt.err (!%p462_p8)
}
 0x418   :  { %s466_s21 = scalar_lea.hbm %s620_s4, 32 }
 0x419   :  { %p467_p9 = scmp.ne.s32.totalorder %s620_s4, %s466_s21  ;;  %p470_p10 = scmp.lt.u32.totalorder %s466_s21, %s620_s4 }
 0x41b   :  { %p472_p11 = pnand %p470_p10, %p467_p9 }
 0x41d   :  { %475 = shalt.err (!%p472_p11)
}
 0x41e   :  { %302 = dma.vmem_to_hbm [thread:$0]  %s300_s18, 32, %s620_s4, [#allocation4]  }
 0x41f   :  { %480 = dma.done.wait [#allocation4], 32  }
 0x420   :  { %481 = vsyncadd [#allocation4], 4294967264 }
 0x421   :  { %482 = dma.done.wait [#allocation10], 32  }
 0x422   :  { %483 = vsyncadd [#allocation10], 4294967264 }
 0x423   :  { %319 = vsyncpa [#allocation3], 1 }
 0x424   :  { %320 = vsyncpa [#allocation6], 1 }
 0x425   :  { %321 = vsyncpa [#allocation4], 1 }
 0x426   :  { %322 = vsyncpa [#allocation10], 1 }

</bundles_post_ra>
